<compile_context>
chip_gen: v7x
topology: tpu7x:2x2x1
jax: 0.10.0
libtpu: 0.0.40
codegen_flags: <defaults>
</compile_context>

<pallas_src>
import functools

import jax
import jax.numpy as jnp
from jax.experimental import pallas as pl
from jax.experimental.pallas import tpu as pltpu


def _dice_stats_kernel(logits_ref, tgt_ref, out_ref, acc_ref, *, hw_total, approx):
    # logits_ref: (Bn, C, T) native dtype   tgt_ref: (Bn, 1, T) int32
    # out_ref:    (Bn, C, 3) f32  packed [intersection, prob_sum, target_sum]
    # acc_ref:    (Bn, C, 3) f32  VMEM accumulator carried across the HW axis
    hw_idx = pl.program_id(1)

    @pl.when(hw_idx == 0)
    def _():
        acc_ref[...] = jnp.zeros_like(acc_ref)

    x = logits_ref[...].astype(jnp.float32)               # (Bn, C, T)
    bn, c, t = x.shape

    # per-pixel softmax over the class (sublane) axis, numerically stable
    m = jnp.max(x, axis=1, keepdims=True)                 # (Bn, 1, T)
    e = jnp.exp(x - m)                                    # (Bn, C, T)
    denom = jnp.sum(e, axis=1, keepdims=True)             # (Bn, 1, T)
    probs = e * pl.reciprocal(denom, approx=approx)       # (Bn, C, T)

    # one-hot of targets along the class axis
    tgt = tgt_ref[...]                                    # (Bn, 1, T) int32
    class_ids = jax.lax.broadcasted_iota(jnp.int32, (bn, c, t), 1)
    one_hot = (tgt == class_ids).astype(jnp.float32)      # (Bn, C, T)

    # mask pixels that are pure padding of the (ragged) last HW tile
    if hw_total is not None:
        pix = hw_idx * t + jax.lax.broadcasted_iota(jnp.int32, (bn, 1, t), 2)
        valid = (pix < hw_total).astype(jnp.float32)      # (Bn, 1, T)
        probs = probs * valid
        one_hot = one_hot * valid

    acc_ref[:, :, 0:1] += jnp.sum(probs * one_hot, axis=2, keepdims=True)
    acc_ref[:, :, 1:2] += jnp.sum(probs, axis=2, keepdims=True)
    acc_ref[:, :, 2:3] += jnp.sum(one_hot, axis=2, keepdims=True)

    @pl.when(hw_idx == pl.num_programs(1) - 1)
    def _():
        out_ref[...] = acc_ref[...]


def _dice_stats(logits_nchw, targets_nhw, *, approx=True):
    N, C, H, W = logits_nchw.shape
    HW = H * W

    # Native-dtype views; the f32 cast happens inside the kernel after the DMA.
    logits = logits_nchw.reshape(N, C, HW)
    targets = targets_nhw.reshape(N, 1, HW)
    if targets.dtype != jnp.int32:
        targets = targets.astype(jnp.int32)

    # ---- tile selection (generation-aware via VMEM capacity) ----
    try:
        vmem_cap = int(pltpu.get_tpu_info().vmem_capacity_bytes)
    except Exception:  # conservative default = smallest (v7x-sized) VMEM
        vmem_cap = 64 * 1024 * 1024
    block_budget = max(512 * 1024, vmem_cap // 16)   # ~4 MiB v7x, ~8 MiB v5e/v6e

    per_pix_bytes = C * logits.dtype.itemsize + 4    # logits + int32 target
    hw_ceil = pl.cdiv(HW, 128) * 128                 # lane-aligned spatial extent
    max_tile = max(128, (block_budget // per_pix_bytes) // 128 * 128)
    tile_hw = min(hw_ceil, max_tile)
    num_hw = pl.cdiv(HW, tile_hw)
    hw_pad = num_hw * tile_hw

    # Batch block: largest divisor of N that still fits the block budget while
    # (for N >= 2) keeping >= 2 parallel batch steps so v7x's two TensorCores
    # both get work; on v5e/v6e the cost of >=2 steps is one ~0.35us overhead.
    bn = 1
    for cand in range(1, N + 1):
        if N % cand:
            continue
        if N >= 2 and (N // cand) < 2:
            continue
        if cand * tile_hw * per_pix_bytes <= block_budget:
            bn = cand
    num_b = N // bn

    if hw_pad != HW:
        logits = jnp.pad(logits, ((0, 0), (0, 0), (0, hw_pad - HW)))
        targets = jnp.pad(targets, ((0, 0), (0, 0), (0, hw_pad - HW)))

    kernel = functools.partial(
        _dice_stats_kernel,
        hw_total=(HW if hw_pad != HW else None),
        approx=approx,
    )

    # Explicit VMEM budget: double-buffered inputs + packed output + scratch.
    vmem_needed = 2 * bn * tile_hw * per_pix_bytes + 3 * bn * C * 3 * 4 + (2 << 20)
    vmem_limit = int(min(max(vmem_needed, 16 << 20), vmem_cap // 2))

    grid_spec = pltpu.PrefetchScalarGridSpec(
        num_scalar_prefetch=0,
        grid=(num_b, num_hw),                         # reduction axis last
        in_specs=[
            pl.BlockSpec((bn, C, tile_hw), lambda b, k: (b, 0, k)),
            pl.BlockSpec((bn, 1, tile_hw), lambda b, k: (b, 0, k)),
        ],
        out_specs=pl.BlockSpec((bn, C, 3), lambda b, k: (b, 0, 0)),
        scratch_shapes=[pltpu.VMEM((bn, C, 3), jnp.float32)],
    )
    stats = pl.pallas_call(
        kernel,
        out_shape=jax.ShapeDtypeStruct((N, C, 3), jnp.float32),
        grid_spec=grid_spec,
        compiler_params=pltpu.CompilerParams(
            dimension_semantics=("parallel", "arbitrary"),
            vmem_limit_bytes=vmem_limit,
        ),
    )(logits, targets)
    return stats[..., 0], stats[..., 1], stats[..., 2]   # inter, psum, tsum


def dice_loss(logits_nchw, targets_nhw, weight=None, smooth=1e-5, approx=True):
    """Matches PyTorch DiceLoss.forward semantics."""
    inter, psum, tsum = _dice_stats(logits_nchw, targets_nhw, approx=approx)
    dice = (2.0 * inter + smooth) / (psum + tsum + smooth)   # (N, C)
    per_class = jnp.mean(dice, axis=0)                       # (C,)
    if weight is not None:
        per_class = jnp.asarray(weight, jnp.float32) * per_class
    return 1.0 - jnp.mean(per_class)


def _dice_loss_ref(logits_nchw, targets_nhw, weight=None, smooth=1e-5):
    # pure-JAX reference for correctness checking
    N, C, H, W = logits_nchw.shape
    probs = jax.nn.softmax(logits_nchw.astype(jnp.float32), axis=1)
    one_hot = jax.nn.one_hot(targets_nhw, C, dtype=jnp.float32)   # (N,H,W,C)
    one_hot = jnp.transpose(one_hot, (0, 3, 1, 2))                # (N,C,H,W)
    inter = jnp.sum(probs * one_hot, axis=(2, 3))
    union = jnp.sum(probs, axis=(2, 3)) + jnp.sum(one_hot, axis=(2, 3))
    dice = (2.0 * inter + smooth) / (union + smooth)
    per_class = jnp.mean(dice, axis=0)
    if weight is not None:
        per_class = jnp.asarray(weight, jnp.float32) * per_class
    return 1.0 - jnp.mean(per_class)


if __name__ == "__main__":
    key = jax.random.PRNGKey(0)
    k_logits, k_tgt = jax.random.split(key)

    N, C, H, W = 2, 4, 16, 16
    logits = jax.random.normal(k_logits, (N, C, H, W), dtype=jnp.float32)
    targets = jax.random.randint(k_tgt, (N, H, W), 0, C, dtype=jnp.int32)

    ref = _dice_loss_ref(logits, targets)

    # 1) exact-reciprocal path: tight agreement with the pure-JAX reference
    loss_exact = jax.block_until_ready(dice_loss(logits, targets, approx=False))
    assert jnp.allclose(loss_exact, ref, atol=1e-5, rtol=1e-5), (loss_exact, ref)

    # 2) default optimized path (EUP approximate reciprocal): loose tolerance
    loss = jax.block_until_ready(dice_loss(logits, targets))
    assert jnp.allclose(loss, ref, atol=1e-2, rtol=1e-2), (loss, ref)

    # 3) native bf16 logits path (no wrapper up-cast; cast happens in-kernel)
    logits_bf16 = logits.astype(jnp.bfloat16)
    ref_bf16 = _dice_loss_ref(logits_bf16, targets)
    loss_bf16 = jax.block_until_ready(dice_loss(logits_bf16, targets, approx=False))
    assert jnp.allclose(loss_bf16, ref_bf16, atol=1e-5, rtol=1e-5), (loss_bf16, ref_bf16)

    print("KERNEL_OK")
</pallas_src>

<mosaic_0001>
module attributes {stable_mosaic.version = 11 : i64} {
  func.func @_dice_stats_kernel(%arg0: i32, %arg1: i32, %arg2: memref<1x4x256xf32, #tpu.memory_space<vmem>>, %arg3: memref<1x1x256xi32, #tpu.memory_space<vmem>>, %arg4: memref<1x4x3xf32, #tpu.memory_space<vmem>>, %arg5: memref<1x4x3xf32, #tpu.memory_space<vmem>>) attributes {dimension_semantics = [#tpu.dimension_semantics<parallel>, #tpu.dimension_semantics<arbitrary>], iteration_bounds = array<i64: 2, 1>, scalar_prefetch = 0 : i64, scratch_operands = 1 : i64, tpu.core_type = #tpu.core_type<tc>, window_params = [{transform_indices = @transform_0, window_bounds = array<i64: 1, 4, 256>}, {transform_indices = @transform_1, window_bounds = array<i64: 1, 1, 256>}, {transform_indices = @transform_2, window_bounds = array<i64: 1, 4, 3>}]} {
    %c0_i32 = arith.constant 0 : i32
    %0 = arith.cmpi eq, %arg1, %c0_i32 : i32
    %1 = arith.extui %0 : i1 to i32
    %c0_i32_0 = arith.constant 0 : i32
    %2 = arith.cmpi ne, %1, %c0_i32_0 : i32
    scf.if %2 {
      %cst_28 = arith.constant 0.000000e+00 : f32
      %39 = vector.broadcast %cst_28 : f32 to vector<1x4x3xf32>
      %c0_29 = arith.constant 0 : index
      %c0_30 = arith.constant 0 : index
      %c0_31 = arith.constant 0 : index
      %40 = vector.load %arg5[%c0_29, %c0_30, %c0_31] : memref<1x4x3xf32, #tpu.memory_space<vmem>>, vector<1x4x3xf32>
      tpu.vector_store %arg5[%c0_29, %c0_30, %c0_31], %39 {strides = array<i32>} : memref<1x4x3xf32, #tpu.memory_space<vmem>>, vector<1x4x3xf32>,
    } else {
    }
    %c0 = arith.constant 0 : index
    %c0_1 = arith.constant 0 : index
    %c0_2 = arith.constant 0 : index
    %3 = vector.load %arg2[%c0, %c0_1, %c0_2] : memref<1x4x256xf32, #tpu.memory_space<vmem>>, vector<1x4x256xf32>
    %cst = arith.constant dense<0xFF800000> : vector<1x256xf32>
    %4 = vector.multi_reduction <maximumf>, %3, %cst [1] : vector<1x4x256xf32> to vector<1x256xf32>
    %5 = vector.shape_cast %4 : vector<1x256xf32> to vector<1x1x256xf32>
    %6 = vector.broadcast %5 : vector<1x1x256xf32> to vector<1x4x256xf32>
    %7 = arith.subf %3, %6 : vector<1x4x256xf32>
    %8 = math.exp %7 : vector<1x4x256xf32>
    %cst_3 = arith.constant dense<0.000000e+00> : vector<1x256xf32>
    %9 = vector.multi_reduction <add>, %8, %cst_3 [1] : vector<1x4x256xf32> to vector<1x256xf32>
    %10 = vector.shape_cast %9 : vector<1x256xf32> to vector<1x1x256xf32>
    %11 = tpu.reciprocal %10 : vector<1x1x256xf32> -> vector<1x1x256xf32>
    %12 = vector.broadcast %11 : vector<1x1x256xf32> to vector<1x4x256xf32>
    %13 = arith.mulf %8, %12 : vector<1x4x256xf32>
    %c0_4 = arith.constant 0 : index
    %c0_5 = arith.constant 0 : index
    %c0_6 = arith.constant 0 : index
    %14 = vector.load %arg3[%c0_4, %c0_5, %c0_6] : memref<1x1x256xi32, #tpu.memory_space<vmem>>, vector<1x1x256xi32>
    %15 = tpu.iota {dimensions = array<i32: 1>} : vector<1x4x256xi32>
    %16 = vector.broadcast %14 : vector<1x1x256xi32> to vector<1x4x256xi32>
    %17 = arith.cmpi eq, %16, %15 : vector<1x4x256xi32>
    %18 = arith.extui %17 : vector<1x4x256xi1> to vector<1x4x256xi32>
    %19 = arith.sitofp %18 : vector<1x4x256xi32> to vector<1x4x256xf32>
    %c0_7 = arith.constant 0 : index
    %c0_8 = arith.constant 0 : index
    %c0_9 = arith.constant 0 : index
    %20 = vector.load %arg5[%c0_7, %c0_8, %c0_9] : memref<1x4x3xf32, #tpu.memory_space<vmem>>, vector<1x4x1xf32>
    %21 = arith.mulf %13, %19 : vector<1x4x256xf32>
    %cst_10 = arith.constant dense<0.000000e+00> : vector<1x4xf32>
    %22 = vector.multi_reduction <add>, %21, %cst_10 [2] : vector<1x4x256xf32> to vector<1x4xf32>
    %23 = vector.shape_cast %22 : vector<1x4xf32> to vector<1x4x1xf32>
    %24 = arith.addf %20, %23 : vector<1x4x1xf32>
    %c0_11 = arith.constant 0 : index
    %c0_12 = arith.constant 0 : index
    %c0_13 = arith.constant 0 : index
    %25 = vector.load %arg5[%c0_11, %c0_12, %c0_13] : memref<1x4x3xf32, #tpu.memory_space<vmem>>, vector<1x4x1xf32>
    tpu.vector_store %arg5[%c0_11, %c0_12, %c0_13], %24 {strides = array<i32>} : memref<1x4x3xf32, #tpu.memory_space<vmem>>, vector<1x4x1xf32>,
    %c0_14 = arith.constant 0 : index
    %c0_15 = arith.constant 0 : index
    %c1 = arith.constant 1 : index
    %26 = vector.load %arg5[%c0_14, %c0_15, %c1] : memref<1x4x3xf32, #tpu.memory_space<vmem>>, vector<1x4x1xf32>
    %cst_16 = arith.constant dense<0.000000e+00> : vector<1x4xf32>
    %27 = vector.multi_reduction <add>, %13, %cst_16 [2] : vector<1x4x256xf32> to vector<1x4xf32>
    %28 = vector.shape_cast %27 : vector<1x4xf32> to vector<1x4x1xf32>
    %29 = arith.addf %26, %28 : vector<1x4x1xf32>
    %c0_17 = arith.constant 0 : index
    %c0_18 = arith.constant 0 : index
    %c1_19 = arith.constant 1 : index
    %30 = vector.load %arg5[%c0_17, %c0_18, %c1_19] : memref<1x4x3xf32, #tpu.memory_space<vmem>>, vector<1x4x1xf32>
    tpu.vector_store %arg5[%c0_17, %c0_18, %c1_19], %29 {strides = array<i32>} : memref<1x4x3xf32, #tpu.memory_space<vmem>>, vector<1x4x1xf32>,
    %c0_20 = arith.constant 0 : index
    %c0_21 = arith.constant 0 : index
    %c2 = arith.constant 2 : index
    %31 = vector.load %arg5[%c0_20, %c0_21, %c2] : memref<1x4x3xf32, #tpu.memory_space<vmem>>, vector<1x4x1xf32>
    %cst_22 = arith.constant dense<0.000000e+00> : vector<1x4xf32>
    %32 = vector.multi_reduction <add>, %19, %cst_22 [2] : vector<1x4x256xf32> to vector<1x4xf32>
    %33 = vector.shape_cast %32 : vector<1x4xf32> to vector<1x4x1xf32>
    %34 = arith.addf %31, %33 : vector<1x4x1xf32>
    %c0_23 = arith.constant 0 : index
    %c0_24 = arith.constant 0 : index
    %c2_25 = arith.constant 2 : index
    %35 = vector.load %arg5[%c0_23, %c0_24, %c2_25] : memref<1x4x3xf32, #tpu.memory_space<vmem>>, vector<1x4x1xf32>
    tpu.vector_store %arg5[%c0_23, %c0_24, %c2_25], %34 {strides = array<i32>} : memref<1x4x3xf32, #tpu.memory_space<vmem>>, vector<1x4x1xf32>,
    %c0_i32_26 = arith.constant 0 : i32
    %36 = arith.cmpi eq, %arg1, %c0_i32_26 : i32
    %37 = arith.extui %36 : i1 to i32
    %c0_i32_27 = arith.constant 0 : i32
    %38 = arith.cmpi ne, %37, %c0_i32_27 : i32
    scf.if %38 {
      %c0_28 = arith.constant 0 : index
      %c0_29 = arith.constant 0 : index
      %c0_30 = arith.constant 0 : index
      %39 = vector.load %arg5[%c0_28, %c0_29, %c0_30] : memref<1x4x3xf32, #tpu.memory_space<vmem>>, vector<1x4x3xf32>
      %c0_31 = arith.constant 0 : index
      %c0_32 = arith.constant 0 : index
      %c0_33 = arith.constant 0 : index
      %40 = vector.load %arg4[%c0_31, %c0_32, %c0_33] : memref<1x4x3xf32, #tpu.memory_space<vmem>>, vector<1x4x3xf32>
      tpu.vector_store %arg4[%c0_31, %c0_32, %c0_33], %39 {strides = array<i32>} : memref<1x4x3xf32, #tpu.memory_space<vmem>>, vector<1x4x3xf32>,
    } else {
    }
    return
  }
  func.func @transform_0(%arg0: i32, %arg1: i32) -> (i32, i32, i32) {
    %c0_i32 = arith.constant 0 : i32
    %c0_i32_0 = arith.constant 0 : i32
    return %arg0, %c0_i32, %arg1 : i32, i32, i32
  }
  func.func @transform_1(%arg0: i32, %arg1: i32) -> (i32, i32, i32) {
    %c0_i32 = arith.constant 0 : i32
    %c0_i32_0 = arith.constant 0 : i32
    return %arg0, %c0_i32, %arg1 : i32, i32, i32
  }
  func.func @transform_2(%arg0: i32, %arg1: i32) -> (i32, i32, i32) {
    %c0_i32 = arith.constant 0 : i32
    %c0_i32_0 = arith.constant 0 : i32
    %c0_i32_1 = arith.constant 0 : i32
    return %arg0, %c0_i32, %c0_i32_0 : i32, i32, i32
  }
}

</mosaic_0001>

<bundles_post_ra>
// kernel: tpu_custom_call.1
= control target key start
LH: loop header
LB: loop body
LE: loop exit
PB: predicated region body
PF: predicated region fallthrough
CT: control target
= control target key end

     0   :  { %7 = vsyncpa [#allocation4], 0  ;;  %s839_s0 = inlined_call_operand.hbm [shape: f32[2,4,256], index: 0, kind: input, shape index: {}]   ;;  %s840_s1 = inlined_call_operand.hbm [shape: s32[2,1,256], index: 1, kind: input, shape index: {}]   ;;  %s841_s2 = inlined_call_operand.vmem [shape: f32[2,4,3], index: 2, kind: output, shape index: {}]  }
   0x1   :  { %9 = vsyncpa [#allocation4 + $0x1], 0 }
   0x2   :  { %10 = vsyncpa [#allocation6], 0 }
   0x3   :  { %12 = vsyncpa [#allocation6 + $0x1], 0  ;;  %s661_s9 = smov 0   ;;  %s663_s10 = smov 0  }
   0x4   :  { %s665_s11 = smov 0   ;;  %s667_s12 = smov 0  }
   0x5   :  { %s669_s13 = smov 0   ;;  %s671_s14 = smov 0  }
   0x6 LB: > { %s439_s15 = sadd.s32 4294967295, %s641_s14   ;;  %s30_s16 = sadd.s32 1, %s637_s13  ;;  %s641_s14 = sphi %s671_s14, %s18_s14   ;;  %s637_s13 = sphi %s669_s13, %s855_s13   ;;  %s633_s12 = sphi %s667_s12, %s854_s12   ;;  %s629_s11 = sphi %s665_s11, %s853_s11   ;;  %s625_s10 = sphi %s663_s10, %s852_s10   ;;  %s621_s9 = sphi %s661_s9, %s851_s9  }
   0x7   : > { %p32_p0 = scmp.ge.s32.totalorder %s30_s16, 2  ;;  %s39_s17 = sadd.s32 1, %s629_s11 }
   0x8   : > { %p46_p1 = scmp.ne.s32.totalorder %s629_s11, %s625_s10  ;;  %p47_p2 = scmp.eq.s32.totalorder %s641_s14, 0 }
   0x9   : > { %s857_s16 = smov (%p32_p0, %s30_s16), 0  ;;  %p52_p4 = scmp.ne.s32.totalorder %s625_s10, %s621_s9 }
   0xa   : > { %p697_p3 = por %p47_p2, %p46_p1  ;;  %s34_s19 = ssub.s32 %s637_s13, %s857_s16 }
   0xb   : > { %p53_p5 = scmp.eq.s32.totalorder %s439_s15, 0  ;;  %p37_p6 = scmp.eq.s32.totalorder %s34_s19, 0 }
   0xc   : > { %p470_p8 = scmp.lt.s32.totalorder %s641_s14, 2  ;;  %s713_s22 = sand.u32 1, %s629_s11  }
   0xd   : > { %p704_p7 = por %p53_p5, %p52_p4  ;;  %s457_s23 = sshll.u32 %s637_s13, 7 }
   0xe   : > { %s710_s21 = scalar_select %p37_p6, %s629_s11, %s39_s17  }
   0xf   : > { %s844_s20 = scalar_select %p704_p7, 1, 0 }
  0x10   : > { %s443_s24 = sshll.u32 %s713_s22, 3  ;;  %s720_s27 = scalar_lea.hbm %s839_s0, %s457_s23 }
  0x11   : > { %s134_s28 = scalar_lea.vmem [#allocation3], %s443_s24  ;;  %p724_p9 = pnand %p470_p8, %p697_p3 }
  0x12   : > { %s144_s29 = sshll.u32 %s134_s28, 4  ;;  %s131_s3 = scalar_lea.sflag [#allocation4], %s713_s22  ;;  %s728_s29 = int_to_ptr.vmem [resolvable:$true] %s144_s29 }
  0x13   : > { %s527_s4 = scalar_lea.hbm %s720_s27, 128  ;;  %p529_p13 = pneg %p724_p9 }
  0x14   : > { %p528_p12 = scmp.ne.s32.totalorder %s720_s27, %s527_s4  ;;  %s532_s7 = scalar_lea.hbm %s839_s0, 256 }
  0x15   : > { %p533_p2 = scmp.lt.u32.totalorder %s720_s27, %s839_s0  ;;  %p534_p3 = scmp.lt.u32.totalorder %s532_s7, %s527_s4 }
  0x16   : > { %p530_p0 = pnand %p529_p13, %p528_p12  ;;  %p536_p5 = scmp.lt.u32.totalorder %s527_s4, %s720_s27 }
  0x17   : > { %p535_p4 = por %p534_p3, %p533_p2 }
  0x18   : > { %p531_p1 = pneg %p530_p0 }
  0x19   : > { %p537_p6 = por %p536_p5, %p535_p4 }
  0x1b   : > { %p538_p8 = pnand %p537_p6, %p531_p1 }
  0x1d   : > { %541 = shalt.err (!%p538_p8)
}
  0x1e   : > { %s542_s15 = scalar_lea.vmem %s728_s29, 128  ;;  %s643_s17 = smov [#allocation3]  }
  0x1f   : > { %p543_p12 = scmp.ne.s32.totalorder %s728_s29, %s542_s15  ;;  %s547_s18 = sshll.u32 %s643_s17, 4  ;;  %s548_s18 = int_to_ptr.vmem [resolvable:$false] %s547_s18 }
  0x20   : > { %s549_s19 = scalar_lea.vmem %s548_s18, 256  ;;  %p550_p11 = scmp.lt.s32.totalorder %s728_s29, %s548_s18 }
  0x21   : > { %p545_p0 = pnand %p543_p12, %p529_p13  ;;  %p551_p2 = scmp.lt.s32.totalorder %s549_s19, %s542_s15 }
  0x23   : > { %p546_p10 = pneg %p545_p0  ;;  %p552_p3 = por %p551_p2, %p550_p11 }
  0x25   : > { %p553_p4 = pnand %p552_p3, %p546_p10 }
  0x27   : > { %556 = shalt.err (!%p553_p4)
}
  0x28   : > { %466 = dma.hbm_to_vmem [thread:$0]  (!%p724_p9), %s720_s27, 128, %s728_s29, %s131_s3  }
  0x29   : > { %p846_p1 = scmp.lt.s32.totalorder %s641_s14, 3  ;;  %p847_p5 = scmp.ge.s32.totalorder %s641_s14, 1 }
  0x2a   : > { %s446_s24 = sshll.u32 %s713_s22, 1  ;;  %s458_s25 = sshll.u32 %s637_s13, 5 }
  0x2b   : > { %p762_p6 = pnand %p847_p5, %p846_p1  ;;  %s771_s4 = scalar_lea.hbm %s840_s1, %s458_s25 }
  0x2c   : > { %s155_s5 = scalar_lea.vmem [#allocation5], %s446_s24  ;;  %s152_s27 = scalar_lea.sflag [#allocation6], %s713_s22 }
  0x2d   : > { %s848_s23 = scalar_select %p762_p6, 1, 0 }
  0x2e   : > { %s165_s6 = sshll.u32 %s155_s5, 4  ;;  %s557_s29 = scalar_lea.hbm %s771_s4, 32  ;;  %s166_s6 = int_to_ptr.vmem [resolvable:$true] %s165_s6 }
  0x2f   : > { %p558_p10 = scmp.ne.s32.totalorder %s771_s4, %s557_s29  ;;  %s562_s8 = scalar_lea.hbm %s840_s1, 64 }
  0x30   : > { %p563_p12 = scmp.lt.u32.totalorder %s771_s4, %s840_s1  ;;  %p564_p0 = scmp.lt.u32.totalorder %s562_s8, %s557_s29 }
  0x31   : > { %p560_p11 = pnand %p558_p10, %p529_p13  ;;  %p566_p3 = scmp.lt.u32.totalorder %s557_s29, %s771_s4 }
  0x32   : > { %p565_p2 = por %p564_p0, %p563_p12 }
  0x33   : > { %p561_p8 = pneg %p560_p11 }
  0x34   : > { %p567_p4 = por %p566_p3, %p565_p2 }
  0x36   : > { %p568_p1 = pnand %p567_p4, %p561_p8 }
  0x38   : > { %571 = shalt.err (!%p568_p1)
}
  0x39   : > { %s572_s22 = scalar_lea.vmem %s166_s6, 32  ;;  %s644_s17 = smov [#allocation5]  }
  0x3a   : > { %p573_p5 = scmp.ne.s32.totalorder %s166_s6, %s572_s22  ;;  %s577_s18 = sshll.u32 %s644_s17, 4  ;;  %s578_s18 = int_to_ptr.vmem [resolvable:$false] %s577_s18 }
  0x3b   : > { %s579_s19 = scalar_lea.vmem %s578_s18, 64  ;;  %p580_p7 = scmp.lt.s32.totalorder %s166_s6, %s578_s18 }
  0x3c   : > { %p575_p10 = pnand %p573_p5, %p529_p13  ;;  %p581_p6 = scmp.lt.s32.totalorder %s579_s19, %s572_s22 }
  0x3e   : > { %p576_p11 = pneg %p575_p10  ;;  %p582_p0 = por %p581_p6, %p580_p7 }
  0x40   : > { %p583_p12 = pnand %p582_p0, %p576_p11 }
  0x42   : > { %586 = shalt.err (!%p583_p12)
}
  0x43   : > { %469 = dma.hbm_to_vmem [thread:$0]  (!%p724_p9), %s771_s4, 32, %s166_s6, %s152_s27  }
  0x44   : > { %p849_p8 = scmp.ne.s32.totalorder %s848_s23, 0 }
  0x45   : > { %s176_s24 = sand.u32 (!%p849_p8), 1, %s625_s10   ;;  %p850_p13 = scmp.ne.s32.totalorder (!%p849_p8), %s844_s20, 0 }
  0x46   : > { %174 = sbr.rel (%p849_p8) target bundleno = 324 (0x144), region = 28  ;;  %s450_s25 = sshll.u32 (!%p849_p8), %s176_s24, 3 }
  0x47   : > { %s177_s26 = scalar_lea.sflag (!%p849_p8), [#allocation4], %s176_s24  ;;  %s180_s28 = scalar_lea.vmem (!%p849_p8), [#allocation3], %s450_s25 }
  0x4d   : > { %612 = dma.done.wait (%p850_p13), %s177_s26, 128  }
  0x4e   : > { %614 = vsyncadd (%p850_p13), %s177_s26, 4294967168  ;;  %s451_s5 = sshll.u32 %s176_s24, 1  ;;  %s186_s29 = scalar_lea.sflag [#allocation6], %s176_s24 }
  0x4f   : > { %s189_s30 = scalar_lea.vmem [#allocation5], %s451_s5 }
  0x50   : > { %616 = dma.done.wait (%p850_p13), %s186_s29, 32  }
  0x51   : > { %618 = vsyncadd (%p850_p13), %s186_s29, 4294967264  ;;  %vm224_vm0 = vcmask 19456   ;;  %v277_v0 = vlaneseq  ;;  %v645_v1 = vmov 0.0   ;;  %vm230_vm1 = vcmask 1043456   ;;  %v226_v5 = vld [vmem:[%s180_s28] sm:$0xff]  ;;  %p216_p7 = scmp.lt.s32.totalorder %s633_s12, 1 }
  0x52   : > { %225 = vst.msk [vmem:[#allocation2] sm:$0xf] %vm224_vm0, %v645_v1  ;;  %v276_v6 = vld [vmem:[%s189_s30] sm:$0x3]  ;;  %v228_v7 = vcombine.high %v226_v5, %v226_v5  ;;  %v231_v8 = vsel %vm230_vm1, %v226_v5, -inf  ;;  %vm308_vm4 = vcmask 3072  }
  0x53   : > { %v278_v2 = vshrl.u32 %v277_v0, 7  ;;  %v232_v11 = vrot.slane %v231_v8, 4  ;;  %vm320_vm5 = vcmask 11272   ;;  %vm329_vm6 = vcmask 19472   ;;  %s859_s12 = smov (!%p216_p7, %s633_s12), 1 }
  0x54   : > { %v238_v12 = vsel %vm230_vm1, %v228_v7, -inf  ;;  %s452_s20 = sshll.u32 %s859_s12, 2 }
  0x55   : > { %v281_v3 = vsub.s32 0, %v278_v2  ;;  %v285_v4 = vsub.s32 1, %v278_v2  ;;  %v233_v13 = vmax.f32 %v231_v8, %v232_v11  ;;  %v239_v14 = vrot.slane %v238_v12, 4  ;;  %s219_s6 = scalar_lea.vmem %s841_s2, %s452_s20 }
  0x57   : > { %v282_v9 = vrot.slane %v276_v6, %v281_v3  ;;  %v286_v10 = vrot.slane %v276_v6, %v285_v4  ;;  %v234_v19 = vrot.slane %v233_v13, 2  ;;  %v240_v20 = vmax.f32 %v238_v12, %v239_v14 }
  0x59   : > { %vm287_vm2 = vcmp.eq.s32.totalorder %v282_v9, %v278_v2  ;;  %vm288_vm3 = vcmp.eq.s32.totalorder %v286_v10, %v278_v2  ;;  %v235_v22 = vmax.f32 %v233_v13, %v234_v19  ;;  %v241_v23 = vrot.slane %v240_v20, 2  ;;  %v293_v62 = vld [vmem:[#allocation2] sm:$0xf] }
  0x5a   : > { %v453_v15 = vsel %vm287_vm2, 1.0, %v645_v1  ;;  %v454_v16 = vsel %vm288_vm3, 1.0, %v645_v1 }
  0x5b   : > { %v323_v17 = vsel %vm230_vm1, %v453_v15, 0.0  ;;  %v324_v18 = vsel %vm230_vm1, %v454_v16, 0.0  ;;  %v236_v24 = vrot.slane %v235_v22, 1  ;;  %v242_v25 = vmax.f32 %v240_v20, %v241_v23 }
  0x5c   : > { %v325_v21 = vadd.f32 %v324_v18, %v323_v17  ;;  %v296_v51 = vcombine.low %v453_v15, %v454_v16 }
  0x5d   : > { %v237_v26 = vmax.f32 %v235_v22, %v236_v24  ;;  %v243_v27 = vrot.slane %v242_v25, 1 }
  0x5e   : > { %326 = vadd.xlane.f32.xlu1 %v325_v21 }
  0x5f   : > { %v244_v28 = vmax.f32 %v242_v25, %v243_v27 }
  0x61   : > { %v247_v29 = vcombine.low %v237_v26, %v244_v28 }
  0x63   : > { %v249_v30 = vsub.f32 %v226_v5, %v247_v29 }
  0x65   : > { %v250_v31 = vmul.f32 1.442695, %v249_v30 }
  0x67   : > { %521 = vpow2.f32 %v250_v31 }
  0x71   : > { %v522_v32 = vpop.eup %521 }
  0x72   : > { %v253_v33 = vcombine.high %v522_v32, %v522_v32  ;;  %v255_v34 = vsel %vm230_vm1, %v522_v32, 0.0 }
  0x73   : > { %v256_v35 = vrot.slane %v255_v34, 4 }
  0x74   : > { %v262_v36 = vsel %vm230_vm1, %v253_v33, 0.0 }
  0x75   : > { %v257_v37 = vadd.f32 %v256_v35, %v255_v34  ;;  %v263_v38 = vrot.slane %v262_v36, 4 }
  0x77   : > { %v258_v39 = vrot.slane %v257_v37, 2  ;;  %v264_v40 = vadd.f32 %v263_v38, %v262_v36 }
  0x79   : > { %v259_v41 = vadd.f32 %v258_v39, %v257_v37  ;;  %v265_v42 = vrot.slane %v264_v40, 2 }
  0x7b   : > { %v260_v43 = vrot.slane %v259_v41, 1  ;;  %v266_v44 = vadd.f32 %v265_v42, %v264_v40 }
  0x7d   : > { %v261_v45 = vadd.f32 %v260_v43, %v259_v41  ;;  %v267_v46 = vrot.slane %v266_v44, 1 }
  0x7f   : > { %v268_v47 = vadd.f32 %v267_v46, %v266_v44  ;;  %523 = vrcp.f32 %v261_v45 }
  0x81   : > { %525 = vrcp.f32 %v268_v47 }
  0x89   : > { %v524_v48 = vpop.eup %523 }
  0x8b   : > { %v526_v49 = vpop.eup %525 }
  0x8c   : > { %v273_v50 = vcombine.low %v524_v48, %v526_v49 }
  0x8e   : > { %v275_v52 = vmul.f32 %v522_v32, %v273_v50 }
  0x90   : > { %v298_v53 = vmul.f32 %v296_v51, %v275_v52  ;;  %v312_v54 = vcombine.high %v275_v52, %v275_v52  ;;  %v314_v58 = vsel %vm230_vm1, %v275_v52, 0.0 }
  0x92   : > { %v300_v55 = vcombine.high %v298_v53, %v298_v53  ;;  %v302_v56 = vsel %vm230_vm1, %v298_v53, 0.0  ;;  %v315_v59 = vsel %vm230_vm1, %v312_v54, 0.0 }
  0x93   : > { %v316_v61 = vadd.f32 %v315_v59, %v314_v58 }
  0x94   : > { %v303_v57 = vsel %vm230_vm1, %v300_v55, 0.0 }
  0x95   : > { %v304_v60 = vadd.f32 %v303_v57, %v302_v56 }
  0x97   : > { %305 = vadd.xlane.f32.xlu0 %v304_v60 }
  0x9b   : > { %317 = vadd.xlane.f32.xlu0 %v316_v61 }
  0xeb   : > { %v327_v4 = vpop.xlane.xlu1 %326 }
 0x124   : > { %v306_v63 = vpop.xlane.xlu0 %305 }
 0x125   : > { %v307_v0 = vadd.f32 %v306_v63, %v293_v62 }
 0x127   : > { %309 = vst.msk [vmem:[#allocation2] sm:$0xf] %vm308_vm4, %v307_v0 }
 0x128   : > { %v318_v1 = vpop.xlane.xlu0 %317 }
 0x12e   : > { %v310_v2 = vld [vmem:[#allocation2] sm:$0xf] }
 0x12f   : > { %v319_v3 = vadd.f32 %v318_v1, %v310_v2 }
 0x131   : > { %321 = vst.msk [vmem:[#allocation2] sm:$0xf] %vm320_vm5, %v319_v3 }
 0x138   : > { %v322_v5 = vld [vmem:[#allocation2] sm:$0xf] }
 0x139   : > { %v328_v6 = vadd.f32 %v327_v4, %v322_v5 }
 0x13b   : > { %330 = vst.msk [vmem:[#allocation2] sm:$0xf] %vm329_vm6, %v328_v6 }
 0x142   : > { %v334_v7 = vld [vmem:[#allocation2] sm:$0xf] }
 0x143   : > { %336 = vst.msk [vmem:[%s219_s6] sm:$0xf] %vm224_vm0, %v334_v7 }
 0x144 PF: > { %s18_s14 = sadd.s32 1, %s641_s14   ;;  %s851_s9 = smov %s625_s10 }
 0x145   : > { %p15_p9 = scmp.ge.s32.totalorder %s18_s14, 4   ;;  %s852_s10 = smov %s629_s11 }
 0x146   : > { %s853_s11 = smov %s710_s21  ;;  %s854_s12 = smov %s637_s13 }
 0x147   : > { %s855_s13 = smov %s857_s16  ;;  %17 = sbr.rel (!%p15_p9) target bundleno = 6 (0x6), region = 89 }
 0x14e   :  { %356 = vsyncpa [#allocation4], 1 }
 0x14f   :  { %358 = vsyncpa [#allocation4 + $0x1], 1 }
 0x150   :  { %359 = vsyncpa [#allocation6], 1 }
 0x151   :  { %361 = vsyncpa [#allocation6 + $0x1], 1 }

</bundles_post_ra>
